<compile_context>
chip_gen: v6e
topology: v6e:2x2x1
jax: 0.10.0
libtpu: 0.0.40
codegen_flags: <defaults>
</compile_context>

<pallas_src>
import jax
import jax.numpy as jnp
from jax.experimental import pallas as pl
from jax.experimental.pallas import tpu as pltpu

KH = KW = 3   # kernel size
C_IN = 3      # in_channels
C_OUT = 1     # out_channels
CHUNK = 8     # images per in-kernel, vreg-resident chunk (sublane quantum)


def _round_up(a, b):
    return (a + b - 1) // b * b


def _make_kernel(W, HW_pad, chunk):
    CENTER = (KH // 2) * KW + (KW // 2)   # tap (1,1): mask is all ones -> skipped

    def kernel(x_ref, m_ref, w_ref, o_ref):
        # x_ref : (nb, C_IN*HW_pad)          VMEM  channel-fused, lane-dense input
        # m_ref : (KH*KW, chunk, HW_pad)     VMEM  0/1 tap-validity masks
        # w_ref : (C_IN*KH*KW,)              SMEM  flattened filter (scalar reads)
        # o_ref : (nb, HW_pad)               VMEM  single output channel, lane-dense
        nb = o_ref.shape[0]
        n_chunks = nb // chunk

        # Hoist the 27 scalar filter taps (SMEM reads) out of the image loop.
        w = [w_ref[i] for i in range(C_IN * KH * KW)]

        def body(ci, carry):
            r0 = pl.multiple_of(ci * chunk, chunk)
            rows = pl.ds(r0, chunk)
            # Channel slices: static, tile-aligned lane ranges (HW_pad % 128 == 0).
            chans = [
                x_ref[rows, pl.ds(c * HW_pad, HW_pad)].astype(jnp.float32)
                for c in range(C_IN)
            ]
            acc = None
            for kh in range(KH):
                for kw in range(KW):
                    k = kh * KW + kw
                    s = (kh - 1) * W + (kw - 1)     # flat source offset of this tap
                    # Combine channels on the UNshifted data (roll is linear)...
                    tap = chans[0] * w[0 * KH * KW + k]
                    for c in range(1, C_IN):
                        tap = tap + chans[c] * w[c * KH * KW + k]
                    # ...then a single XLU roll per tap (8 per chunk, not 24).
                    if s % HW_pad != 0:
                        # roll(x, (-s) % L)[p] == x[(p + s) mod L]; wrapped lanes
                        # land only where the border mask is 0.
                        tap = pltpu.roll(tap, shift=(-s) % HW_pad, axis=1)
                    if k != CENTER:
                        # Select (not multiply) implements true zero padding even
                        # for non-finite inputs on the wrapped lanes.
                        tap = jnp.where(m_ref[k] != 0.0, tap, 0.0)
                    acc = tap if acc is None else acc + tap
            o_ref[rows, :] = acc.astype(o_ref.dtype)
            return carry

        jax.lax.fori_loop(0, n_chunks, body, 0)

    return kernel


def conv2d_3x3_same(x, weight):
    """x: (N, 3, H, W); weight: (1, 3, 3, 3) -> (N, 1, H, W). SAME padding, no bias."""
    N, C, H, W = x.shape
    assert C == C_IN and weight.shape == (C_OUT, C_IN, KH, KW)
    HW = H * W
    HW_pad = _round_up(HW, 128)          # lane-dense output / tile-aligned channels
    # TODO(synk): for N==1 or very large H*W, add an H-tile grid axis (2-row halo)
    # so v7x's second TensorCore gets work and per-chunk arrays stay in vregs.

    # ---- block / grid sizing -------------------------------------------------
    per_img_bytes = C_IN * HW_pad * x.dtype.itemsize
    target_bytes = 2 * 1024 * 1024       # ~2 MiB input block; double-buffered it
                                         # fits every gen's default scoped VMEM.
    nb_target = max(CHUNK, (target_bytes // max(per_img_bytes, 1)) // CHUNK * CHUNK)
    n_rounded = _round_up(N, CHUNK)
    min_steps = 2 if N >= 2 else 1       # >=2 parallel steps -> both v7x TCs busy
    steps = max(min_steps, pl.cdiv(n_rounded, nb_target))
    nb = _round_up(pl.cdiv(n_rounded, steps), CHUNK)   # multiple of 8, evenly split
    N_pad = steps * nb
    grid = (steps,)

    # ---- data prep (layout-only, single HBM pass inside the kernel) -----------
    x_flat = x.reshape(N, C_IN, HW)
    if HW_pad != HW:
        x_flat = jnp.pad(x_flat, ((0, 0), (0, 0), (0, HW_pad - HW)))
    # Fuse channels onto the lane axis: channel c at lanes [c*HW_pad, (c+1)*HW_pad).
    x_flat = x_flat.reshape(N, C_IN * HW_pad)
    if N_pad != N:
        x_flat = jnp.pad(x_flat, ((0, N_pad - N), (0, 0)))   # pad rows are discarded

    w_flat = weight.reshape(-1).astype(jnp.float32)           # (27,) scalars -> SMEM

    # 0/1 validity mask per (kh, kw) tap, zero in the 1-pixel border and in the
    # HW->HW_pad pad columns; pre-broadcast over CHUNK sublanes for dense loads.
    hh = jnp.arange(H, dtype=jnp.int32).reshape(H, 1)
    ww = jnp.arange(W, dtype=jnp.int32).reshape(1, W)
    masks = []
    for kh in range(KH):
        for kw in range(KW):
            dh, dw = kh - 1, kw - 1
            valid = ((hh + dh >= 0) & (hh + dh < H) &
                     (ww + dw >= 0) & (ww + dw < W)).reshape(HW)
            if HW_pad != HW:
                valid = jnp.pad(valid, (0, HW_pad - HW))
            masks.append(valid)
    mask_arr = jnp.broadcast_to(
        jnp.stack(masks, axis=0).astype(jnp.float32)[:, None, :],
        (KH * KW, CHUNK, HW_pad))

    out_flat = pl.pallas_call(
        _make_kernel(W, HW_pad, CHUNK),
        out_shape=jax.ShapeDtypeStruct((N_pad, HW_pad), x.dtype),
        grid=grid,
        in_specs=[
            # nb images per grid step, channel-fused and lane-dense.
            pl.BlockSpec((nb, C_IN * HW_pad), lambda n: (n, 0)),
            # border masks: same (tiny) block every step.
            pl.BlockSpec((KH * KW, CHUNK, HW_pad), lambda n: (0, 0, 0)),
            # whole filter lives in SMEM, scalar-indexed inside the kernel.
            pl.BlockSpec(memory_space=pltpu.MemorySpace.SMEM),
        ],
        out_specs=pl.BlockSpec((nb, HW_pad), lambda n: (n, 0)),
        compiler_params=pltpu.CompilerParams(
            dimension_semantics=("parallel",)),
    )(x_flat, mask_arr, w_flat)

    return out_flat[:N, :HW].reshape(N, C_OUT, H, W)


if __name__ == "__main__":
    key = jax.random.PRNGKey(0)
    kx, kw_key = jax.random.split(key)

    # Small deterministic example consistent with Conv2d(3 -> 1, 3x3, pad=1).
    N, H, W = 2, 16, 16
    x = jax.random.normal(kx, (N, C_IN, H, W), dtype=jnp.float32)
    weight = jax.random.normal(kw_key, (C_OUT, C_IN, KH, KW), dtype=jnp.float32) * 0.1

    out = conv2d_3x3_same(x, weight)
    out = jax.block_until_ready(out)

    # Sanity check against the XLA reference convolution.
    ref = jax.lax.conv_general_dilated(
        x, weight, window_strides=(1, 1), padding="SAME",
        dimension_numbers=("NCHW", "OIHW", "NCHW"))
    assert out.shape == (N, C_OUT, H, W)
    assert jnp.allclose(out, ref, atol=1e-4, rtol=1e-4)

    print("KERNEL_OK")
</pallas_src>

<mosaic_0001>
module attributes {stable_mosaic.version = 11 : i64} {
  func.func @kernel(%arg0: i32, %arg1: memref<8x768xf32, #tpu.memory_space<vmem>>, %arg2: memref<9x8x256xf32, #tpu.memory_space<vmem>>, %arg3: memref<27xf32, #tpu.memory_space<smem>>, %arg4: memref<8x256xf32, #tpu.memory_space<vmem>>) attributes {dimension_semantics = [#tpu.dimension_semantics<parallel>], iteration_bounds = array<i64: 2>, scalar_prefetch = 0 : i64, scratch_operands = 0 : i64, tpu.core_type = #tpu.core_type<tc>, window_params = [{transform_indices = @transform_0, window_bounds = array<i64: 8, 768>}, {pipeline_mode = #tpu.pipeline_mode<synchronous>, transform_indices = @transform_1, window_bounds = array<i64: 9, 8, 256>}, {transform_indices = @transform_2, window_bounds = array<i64: 27>}, {transform_indices = @transform_3, window_bounds = array<i64: 8, 256>}]} {
    %c0 = arith.constant 0 : index
    %0 = memref.load %arg3[%c0] : memref<27xf32, #tpu.memory_space<smem>>
    %c1 = arith.constant 1 : index
    %1 = memref.load %arg3[%c1] : memref<27xf32, #tpu.memory_space<smem>>
    %c2 = arith.constant 2 : index
    %2 = memref.load %arg3[%c2] : memref<27xf32, #tpu.memory_space<smem>>
    %c3 = arith.constant 3 : index
    %3 = memref.load %arg3[%c3] : memref<27xf32, #tpu.memory_space<smem>>
    %c4 = arith.constant 4 : index
    %4 = memref.load %arg3[%c4] : memref<27xf32, #tpu.memory_space<smem>>
    %c5 = arith.constant 5 : index
    %5 = memref.load %arg3[%c5] : memref<27xf32, #tpu.memory_space<smem>>
    %c6 = arith.constant 6 : index
    %6 = memref.load %arg3[%c6] : memref<27xf32, #tpu.memory_space<smem>>
    %c7 = arith.constant 7 : index
    %7 = memref.load %arg3[%c7] : memref<27xf32, #tpu.memory_space<smem>>
    %c8 = arith.constant 8 : index
    %8 = memref.load %arg3[%c8] : memref<27xf32, #tpu.memory_space<smem>>
    %c9 = arith.constant 9 : index
    %9 = memref.load %arg3[%c9] : memref<27xf32, #tpu.memory_space<smem>>
    %c10 = arith.constant 10 : index
    %10 = memref.load %arg3[%c10] : memref<27xf32, #tpu.memory_space<smem>>
    %c11 = arith.constant 11 : index
    %11 = memref.load %arg3[%c11] : memref<27xf32, #tpu.memory_space<smem>>
    %c12 = arith.constant 12 : index
    %12 = memref.load %arg3[%c12] : memref<27xf32, #tpu.memory_space<smem>>
    %c13 = arith.constant 13 : index
    %13 = memref.load %arg3[%c13] : memref<27xf32, #tpu.memory_space<smem>>
    %c14 = arith.constant 14 : index
    %14 = memref.load %arg3[%c14] : memref<27xf32, #tpu.memory_space<smem>>
    %c15 = arith.constant 15 : index
    %15 = memref.load %arg3[%c15] : memref<27xf32, #tpu.memory_space<smem>>
    %c16 = arith.constant 16 : index
    %16 = memref.load %arg3[%c16] : memref<27xf32, #tpu.memory_space<smem>>
    %c17 = arith.constant 17 : index
    %17 = memref.load %arg3[%c17] : memref<27xf32, #tpu.memory_space<smem>>
    %c18 = arith.constant 18 : index
    %18 = memref.load %arg3[%c18] : memref<27xf32, #tpu.memory_space<smem>>
    %c19 = arith.constant 19 : index
    %19 = memref.load %arg3[%c19] : memref<27xf32, #tpu.memory_space<smem>>
    %c20 = arith.constant 20 : index
    %20 = memref.load %arg3[%c20] : memref<27xf32, #tpu.memory_space<smem>>
    %c21 = arith.constant 21 : index
    %21 = memref.load %arg3[%c21] : memref<27xf32, #tpu.memory_space<smem>>
    %c22 = arith.constant 22 : index
    %22 = memref.load %arg3[%c22] : memref<27xf32, #tpu.memory_space<smem>>
    %c23 = arith.constant 23 : index
    %23 = memref.load %arg3[%c23] : memref<27xf32, #tpu.memory_space<smem>>
    %c24 = arith.constant 24 : index
    %24 = memref.load %arg3[%c24] : memref<27xf32, #tpu.memory_space<smem>>
    %c25 = arith.constant 25 : index
    %25 = memref.load %arg3[%c25] : memref<27xf32, #tpu.memory_space<smem>>
    %c26 = arith.constant 26 : index
    %26 = memref.load %arg3[%c26] : memref<27xf32, #tpu.memory_space<smem>>
    %c0_i32 = arith.constant 0 : i32
    %c8_i32 = arith.constant 8 : i32
    %27 = arith.muli %c0_i32, %c8_i32 : i32
    %28 = tpu.assume_multiple %27, 8 : i32
    %29 = arith.index_cast %28 : i32 to index
    %c0_0 = arith.constant 0 : index
    %30 = vector.load %arg1[%29, %c0_0] : memref<8x768xf32, #tpu.memory_space<vmem>>, vector<8x256xf32>
    %31 = arith.index_cast %28 : i32 to index
    %c256 = arith.constant 256 : index
    %32 = vector.load %arg1[%31, %c256] : memref<8x768xf32, #tpu.memory_space<vmem>>, vector<8x256xf32>
    %33 = arith.index_cast %28 : i32 to index
    %c512 = arith.constant 512 : index
    %34 = vector.load %arg1[%33, %c512] : memref<8x768xf32, #tpu.memory_space<vmem>>, vector<8x256xf32>
    %35 = vector.broadcast %0 : f32 to vector<8x256xf32>
    %36 = arith.mulf %30, %35 : vector<8x256xf32>
    %37 = vector.broadcast %9 : f32 to vector<8x256xf32>
    %38 = arith.mulf %32, %37 : vector<8x256xf32>
    %39 = arith.addf %36, %38 : vector<8x256xf32>
    %40 = vector.broadcast %18 : f32 to vector<8x256xf32>
    %41 = arith.mulf %34, %40 : vector<8x256xf32>
    %42 = arith.addf %39, %41 : vector<8x256xf32>
    %c17_i32 = arith.constant 17 : i32
    %43 = tpu.dynamic_rotate %42 by %c17_i32 dim 1 : vector<8x256xf32>, i32 -> vector<8x256xf32>
    %c0_1 = arith.constant 0 : index
    %c0_2 = arith.constant 0 : index
    %c0_3 = arith.constant 0 : index
    %44 = vector.load %arg2[%c0_1, %c0_2, %c0_3] : memref<9x8x256xf32, #tpu.memory_space<vmem>>, vector<1x8x256xf32>
    %45 = vector.shape_cast %44 : vector<1x8x256xf32> to vector<8x256xf32>
    %cst = arith.constant 0.000000e+00 : f32
    %46 = vector.broadcast %cst : f32 to vector<8x256xf32>
    %47 = arith.cmpf one, %45, %46 : vector<8x256xf32>
    %cst_4 = arith.constant 0.000000e+00 : f32
    %48 = vector.broadcast %cst_4 : f32 to vector<8x256xf32>
    %49 = arith.select %47, %43, %48 : vector<8x256xi1>, vector<8x256xf32>
    %50 = vector.broadcast %1 : f32 to vector<8x256xf32>
    %51 = arith.mulf %30, %50 : vector<8x256xf32>
    %52 = vector.broadcast %10 : f32 to vector<8x256xf32>
    %53 = arith.mulf %32, %52 : vector<8x256xf32>
    %54 = arith.addf %51, %53 : vector<8x256xf32>
    %55 = vector.broadcast %19 : f32 to vector<8x256xf32>
    %56 = arith.mulf %34, %55 : vector<8x256xf32>
    %57 = arith.addf %54, %56 : vector<8x256xf32>
    %c16_i32 = arith.constant 16 : i32
    %58 = tpu.dynamic_rotate %57 by %c16_i32 dim 1 : vector<8x256xf32>, i32 -> vector<8x256xf32>
    %c1_5 = arith.constant 1 : index
    %c0_6 = arith.constant 0 : index
    %c0_7 = arith.constant 0 : index
    %59 = vector.load %arg2[%c1_5, %c0_6, %c0_7] : memref<9x8x256xf32, #tpu.memory_space<vmem>>, vector<1x8x256xf32>
    %60 = vector.shape_cast %59 : vector<1x8x256xf32> to vector<8x256xf32>
    %cst_8 = arith.constant 0.000000e+00 : f32
    %61 = vector.broadcast %cst_8 : f32 to vector<8x256xf32>
    %62 = arith.cmpf one, %60, %61 : vector<8x256xf32>
    %cst_9 = arith.constant 0.000000e+00 : f32
    %63 = vector.broadcast %cst_9 : f32 to vector<8x256xf32>
    %64 = arith.select %62, %58, %63 : vector<8x256xi1>, vector<8x256xf32>
    %65 = arith.addf %49, %64 : vector<8x256xf32>
    %66 = vector.broadcast %2 : f32 to vector<8x256xf32>
    %67 = arith.mulf %30, %66 : vector<8x256xf32>
    %68 = vector.broadcast %11 : f32 to vector<8x256xf32>
    %69 = arith.mulf %32, %68 : vector<8x256xf32>
    %70 = arith.addf %67, %69 : vector<8x256xf32>
    %71 = vector.broadcast %20 : f32 to vector<8x256xf32>
    %72 = arith.mulf %34, %71 : vector<8x256xf32>
    %73 = arith.addf %70, %72 : vector<8x256xf32>
    %c15_i32 = arith.constant 15 : i32
    %74 = tpu.dynamic_rotate %73 by %c15_i32 dim 1 : vector<8x256xf32>, i32 -> vector<8x256xf32>
    %c2_10 = arith.constant 2 : index
    %c0_11 = arith.constant 0 : index
    %c0_12 = arith.constant 0 : index
    %75 = vector.load %arg2[%c2_10, %c0_11, %c0_12] : memref<9x8x256xf32, #tpu.memory_space<vmem>>, vector<1x8x256xf32>
    %76 = vector.shape_cast %75 : vector<1x8x256xf32> to vector<8x256xf32>
    %cst_13 = arith.constant 0.000000e+00 : f32
    %77 = vector.broadcast %cst_13 : f32 to vector<8x256xf32>
    %78 = arith.cmpf one, %76, %77 : vector<8x256xf32>
    %cst_14 = arith.constant 0.000000e+00 : f32
    %79 = vector.broadcast %cst_14 : f32 to vector<8x256xf32>
    %80 = arith.select %78, %74, %79 : vector<8x256xi1>, vector<8x256xf32>
    %81 = arith.addf %65, %80 : vector<8x256xf32>
    %82 = vector.broadcast %3 : f32 to vector<8x256xf32>
    %83 = arith.mulf %30, %82 : vector<8x256xf32>
    %84 = vector.broadcast %12 : f32 to vector<8x256xf32>
    %85 = arith.mulf %32, %84 : vector<8x256xf32>
    %86 = arith.addf %83, %85 : vector<8x256xf32>
    %87 = vector.broadcast %21 : f32 to vector<8x256xf32>
    %88 = arith.mulf %34, %87 : vector<8x256xf32>
    %89 = arith.addf %86, %88 : vector<8x256xf32>
    %c1_i32 = arith.constant 1 : i32
    %90 = tpu.dynamic_rotate %89 by %c1_i32 dim 1 : vector<8x256xf32>, i32 -> vector<8x256xf32>
    %c3_15 = arith.constant 3 : index
    %c0_16 = arith.constant 0 : index
    %c0_17 = arith.constant 0 : index
    %91 = vector.load %arg2[%c3_15, %c0_16, %c0_17] : memref<9x8x256xf32, #tpu.memory_space<vmem>>, vector<1x8x256xf32>
    %92 = vector.shape_cast %91 : vector<1x8x256xf32> to vector<8x256xf32>
    %cst_18 = arith.constant 0.000000e+00 : f32
    %93 = vector.broadcast %cst_18 : f32 to vector<8x256xf32>
    %94 = arith.cmpf one, %92, %93 : vector<8x256xf32>
    %cst_19 = arith.constant 0.000000e+00 : f32
    %95 = vector.broadcast %cst_19 : f32 to vector<8x256xf32>
    %96 = arith.select %94, %90, %95 : vector<8x256xi1>, vector<8x256xf32>
    %97 = arith.addf %81, %96 : vector<8x256xf32>
    %98 = vector.broadcast %4 : f32 to vector<8x256xf32>
    %99 = arith.mulf %30, %98 : vector<8x256xf32>
    %100 = vector.broadcast %13 : f32 to vector<8x256xf32>
    %101 = arith.mulf %32, %100 : vector<8x256xf32>
    %102 = arith.addf %99, %101 : vector<8x256xf32>
    %103 = vector.broadcast %22 : f32 to vector<8x256xf32>
    %104 = arith.mulf %34, %103 : vector<8x256xf32>
    %105 = arith.addf %102, %104 : vector<8x256xf32>
    %106 = arith.addf %97, %105 : vector<8x256xf32>
    %107 = vector.broadcast %5 : f32 to vector<8x256xf32>
    %108 = arith.mulf %30, %107 : vector<8x256xf32>
    %109 = vector.broadcast %14 : f32 to vector<8x256xf32>
    %110 = arith.mulf %32, %109 : vector<8x256xf32>
    %111 = arith.addf %108, %110 : vector<8x256xf32>
    %112 = vector.broadcast %23 : f32 to vector<8x256xf32>
    %113 = arith.mulf %34, %112 : vector<8x256xf32>
    %114 = arith.addf %111, %113 : vector<8x256xf32>
    %c255_i32 = arith.constant 255 : i32
    %115 = tpu.dynamic_rotate %114 by %c255_i32 dim 1 : vector<8x256xf32>, i32 -> vector<8x256xf32>
    %c5_20 = arith.constant 5 : index
    %c0_21 = arith.constant 0 : index
    %c0_22 = arith.constant 0 : index
    %116 = vector.load %arg2[%c5_20, %c0_21, %c0_22] : memref<9x8x256xf32, #tpu.memory_space<vmem>>, vector<1x8x256xf32>
    %117 = vector.shape_cast %116 : vector<1x8x256xf32> to vector<8x256xf32>
    %cst_23 = arith.constant 0.000000e+00 : f32
    %118 = vector.broadcast %cst_23 : f32 to vector<8x256xf32>
    %119 = arith.cmpf one, %117, %118 : vector<8x256xf32>
    %cst_24 = arith.constant 0.000000e+00 : f32
    %120 = vector.broadcast %cst_24 : f32 to vector<8x256xf32>
    %121 = arith.select %119, %115, %120 : vector<8x256xi1>, vector<8x256xf32>
    %122 = arith.addf %106, %121 : vector<8x256xf32>
    %123 = vector.broadcast %6 : f32 to vector<8x256xf32>
    %124 = arith.mulf %30, %123 : vector<8x256xf32>
    %125 = vector.broadcast %15 : f32 to vector<8x256xf32>
    %126 = arith.mulf %32, %125 : vector<8x256xf32>
    %127 = arith.addf %124, %126 : vector<8x256xf32>
    %128 = vector.broadcast %24 : f32 to vector<8x256xf32>
    %129 = arith.mulf %34, %128 : vector<8x256xf32>
    %130 = arith.addf %127, %129 : vector<8x256xf32>
    %c241_i32 = arith.constant 241 : i32
    %131 = tpu.dynamic_rotate %130 by %c241_i32 dim 1 : vector<8x256xf32>, i32 -> vector<8x256xf32>
    %c6_25 = arith.constant 6 : index
    %c0_26 = arith.constant 0 : index
    %c0_27 = arith.constant 0 : index
    %132 = vector.load %arg2[%c6_25, %c0_26, %c0_27] : memref<9x8x256xf32, #tpu.memory_space<vmem>>, vector<1x8x256xf32>
    %133 = vector.shape_cast %132 : vector<1x8x256xf32> to vector<8x256xf32>
    %cst_28 = arith.constant 0.000000e+00 : f32
    %134 = vector.broadcast %cst_28 : f32 to vector<8x256xf32>
    %135 = arith.cmpf one, %133, %134 : vector<8x256xf32>
    %cst_29 = arith.constant 0.000000e+00 : f32
    %136 = vector.broadcast %cst_29 : f32 to vector<8x256xf32>
    %137 = arith.select %135, %131, %136 : vector<8x256xi1>, vector<8x256xf32>
    %138 = arith.addf %122, %137 : vector<8x256xf32>
    %139 = vector.broadcast %7 : f32 to vector<8x256xf32>
    %140 = arith.mulf %30, %139 : vector<8x256xf32>
    %141 = vector.broadcast %16 : f32 to vector<8x256xf32>
    %142 = arith.mulf %32, %141 : vector<8x256xf32>
    %143 = arith.addf %140, %142 : vector<8x256xf32>
    %144 = vector.broadcast %25 : f32 to vector<8x256xf32>
    %145 = arith.mulf %34, %144 : vector<8x256xf32>
    %146 = arith.addf %143, %145 : vector<8x256xf32>
    %c240_i32 = arith.constant 240 : i32
    %147 = tpu.dynamic_rotate %146 by %c240_i32 dim 1 : vector<8x256xf32>, i32 -> vector<8x256xf32>
    %c7_30 = arith.constant 7 : index
    %c0_31 = arith.constant 0 : index
    %c0_32 = arith.constant 0 : index
    %148 = vector.load %arg2[%c7_30, %c0_31, %c0_32] : memref<9x8x256xf32, #tpu.memory_space<vmem>>, vector<1x8x256xf32>
    %149 = vector.shape_cast %148 : vector<1x8x256xf32> to vector<8x256xf32>
    %cst_33 = arith.constant 0.000000e+00 : f32
    %150 = vector.broadcast %cst_33 : f32 to vector<8x256xf32>
    %151 = arith.cmpf one, %149, %150 : vector<8x256xf32>
    %cst_34 = arith.constant 0.000000e+00 : f32
    %152 = vector.broadcast %cst_34 : f32 to vector<8x256xf32>
    %153 = arith.select %151, %147, %152 : vector<8x256xi1>, vector<8x256xf32>
    %154 = arith.addf %138, %153 : vector<8x256xf32>
    %155 = vector.broadcast %8 : f32 to vector<8x256xf32>
    %156 = arith.mulf %30, %155 : vector<8x256xf32>
    %157 = vector.broadcast %17 : f32 to vector<8x256xf32>
    %158 = arith.mulf %32, %157 : vector<8x256xf32>
    %159 = arith.addf %156, %158 : vector<8x256xf32>
    %160 = vector.broadcast %26 : f32 to vector<8x256xf32>
    %161 = arith.mulf %34, %160 : vector<8x256xf32>
    %162 = arith.addf %159, %161 : vector<8x256xf32>
    %c239_i32 = arith.constant 239 : i32
    %163 = tpu.dynamic_rotate %162 by %c239_i32 dim 1 : vector<8x256xf32>, i32 -> vector<8x256xf32>
    %c8_35 = arith.constant 8 : index
    %c0_36 = arith.constant 0 : index
    %c0_37 = arith.constant 0 : index
    %164 = vector.load %arg2[%c8_35, %c0_36, %c0_37] : memref<9x8x256xf32, #tpu.memory_space<vmem>>, vector<1x8x256xf32>
    %165 = vector.shape_cast %164 : vector<1x8x256xf32> to vector<8x256xf32>
    %cst_38 = arith.constant 0.000000e+00 : f32
    %166 = vector.broadcast %cst_38 : f32 to vector<8x256xf32>
    %167 = arith.cmpf one, %165, %166 : vector<8x256xf32>
    %cst_39 = arith.constant 0.000000e+00 : f32
    %168 = vector.broadcast %cst_39 : f32 to vector<8x256xf32>
    %169 = arith.select %167, %163, %168 : vector<8x256xi1>, vector<8x256xf32>
    %170 = arith.addf %154, %169 : vector<8x256xf32>
    %171 = arith.index_cast %28 : i32 to index
    %c0_40 = arith.constant 0 : index
    %172 = vector.load %arg4[%171, %c0_40] : memref<8x256xf32, #tpu.memory_space<vmem>>, vector<8x256xf32>
    tpu.vector_store %arg4[%171, %c0_40], %170 {strides = array<i32>} : memref<8x256xf32, #tpu.memory_space<vmem>>, vector<8x256xf32>,
    %c1_i32_41 = arith.constant 1 : i32
    return
  }
  func.func @transform_0(%arg0: i32) -> (i32, i32) {
    %c0_i32 = arith.constant 0 : i32
    %c0_i32_0 = arith.constant 0 : i32
    return %arg0, %c0_i32 : i32, i32
  }
  func.func @transform_1(%arg0: i32) -> (i32, i32, i32) {
    %c0_i32 = arith.constant 0 : i32
    %c0_i32_0 = arith.constant 0 : i32
    %c0_i32_1 = arith.constant 0 : i32
    %c0_i32_2 = arith.constant 0 : i32
    return %c0_i32, %c0_i32_0, %c0_i32_1 : i32, i32, i32
  }
  func.func @transform_2(%arg0: i32) -> i32 {
    %c0_i32 = arith.constant 0 : i32
    %c0_i32_0 = arith.constant 0 : i32
    return %c0_i32 : i32
  }
  func.func @transform_3(%arg0: i32) -> (i32, i32) {
    %c0_i32 = arith.constant 0 : i32
    %c0_i32_0 = arith.constant 0 : i32
    return %arg0, %c0_i32 : i32, i32
  }
}

</mosaic_0001>

<bundles_post_ra>
// kernel: tpu_custom_call.1
= control target key start
LH: loop header
LB: loop body
LE: loop exit
PB: predicated region body
PF: predicated region fallthrough
CT: control target
= control target key end

     0   :  { %8 = vsyncpa [#allocation3], 0  ;;  %s1236_s0 = inlined_call_operand.hbm [shape: f32[16,768], index: 0, kind: input, shape index: {}]   ;;  %s1237_s1 = inlined_call_operand.hbm [shape: f32[9,8,256], index: 1, kind: input, shape index: {}]   ;;  %s1238_s2 = inlined_call_operand.vmem [shape: f32[27], index: 2, kind: input, shape index: {}]   ;;  %s1239_s3 = inlined_call_operand.hbm [shape: f32[16,256], index: 3, kind: output, shape index: {}]  }
   0x1   :  { %10 = vsyncpa [#allocation3 + $0x1], 0 }
   0x2   :  { %11 = vsyncpa [#allocation7], 0 }
   0x3   :  { %12 = vsyncpa [#allocation5], 0 }
   0x4   :  { %13 = vsyncpa [#allocation4], 0 }
   0x5   :  { %15 = vsyncpa [#allocation4 + $0x1], 0  ;;  %s909_s12 = smov 0   ;;  %s911_s13 = smov 0  }
   0x6   :  { %s913_s14 = smov 0   ;;  %s915_s15 = smov 0  }
   0x7 LB: > { %s930_s16 = sadd.s32 4294967295, %s873_s15   ;;  %s610_s17 = sadd.s32 4294967294, %s873_s15   ;;  %s873_s15 = sphi %s915_s15, %s1263_s15   ;;  %s869_s14 = sphi %s913_s14, %s1262_s14   ;;  %s865_s13 = sphi %s911_s13, %s1261_s13   ;;  %s861_s12 = sphi %s909_s12, %s1260_s12  }
   0x8   : > { %p41_p0 = scmp.ne.s32.totalorder %s865_s13, %s861_s12  ;;  %p1240_p1 = scmp.eq.s32.totalorder %s930_s16, 0 }
   0x9   : > { %p113_p3 = scmp.eq.s32.totalorder %s610_s17, 1  ;;  %p611_p5 = scmp.ge.s32.totalorder %s873_s15, 1 }
   0xa   : > { %p939_p4 = por %p1240_p1, %p41_p0  ;;  %p120_p7 = scmp.lt.s32.totalorder %s873_s15, 3 }
   0xb   : > { %p944_p6 = por %p113_p3, %p41_p0  ;;  %s875_s21 = smov [#allocation6]  }
   0xc   : > { %s1244_s18 = scalar_select %p939_p4, 1, 0 }
   0xd   : > { %s1245_s19 = scalar_select %p944_p6, 1, 0 }
   0xe   : > { %p949_p8 = pnand %p611_p5, %p120_p7  ;;  %s132_s22 = sshll.u32 %s875_s21, 4  ;;  %s133_s22 = int_to_ptr.vmem [resolvable:$true] %s132_s22 }
   0xf   : > { %s146_s25 = sshll.u32 %s1238_s2, 4  ;;  %s743_s27 = scalar_lea.vmem %s133_s22, 2304  ;;  %s147_s25 = int_to_ptr.vmem [resolvable:$true] %s146_s25 }
  0x10   : > { %s1246_s20 = scalar_select %p949_p8, 1, 0 }
  0x11   : > { %p667_p9 = pneg %p949_p8  ;;  %p744_p13 = scmp.ne.s32.totalorder %s133_s22, %s743_s27 }
  0x12   : > { %p751_p5 = scmp.lt.s32.totalorder %s133_s22, %s133_s22  ;;  %p752_p7 = scmp.lt.s32.totalorder %s743_s27, %s743_s27 }
  0x13   : > { %p961_p11 = pnand %p667_p9, %p1240_p1 }
  0x14   : > { %p753_p10 = por %p752_p7, %p751_p5 }
  0x15   : > { %p734_p12 = pneg %p961_p11 }
  0x17   : > { %p746_p0 = pnand %p744_p13, %p734_p12 }
  0x19   : > { %p747_p3 = pneg %p746_p0 }
  0x1b   : > { %p754_p2 = pnand %p753_p10, %p747_p3 }
  0x1d   : > { %757 = shalt.err (!%p754_p2)
}
  0x1e   : > { %s876_s28 = smov 256   ;;  %s877_s29 = smov 16  }
  0x1f   : > { %670 = dma.hbm_to_vmem [thread:$0]  (!%p961_p11), %s1237_s1, 2304, %s133_s22, [#allocation7], %s876_s28, %s876_s28, %s877_s29  }
  0x20   : > { %s758_s5 = scalar_lea.vmem %s147_s25, 16  ;;  %p766_p1 = scmp.lt.s32.totalorder %s147_s25, %s147_s25 }
  0x21   : > { %p759_p9 = scmp.ne.s32.totalorder %s147_s25, %s758_s5  ;;  %p767_p6 = scmp.lt.s32.totalorder %s758_s5, %s758_s5 }
  0x23   : > { %p761_p13 = pnand %p759_p9, %p734_p12  ;;  %p768_p5 = por %p767_p6, %p766_p1 }
  0x25   : > { %p762_p0 = pneg %p761_p13 }
  0x27   : > { %p769_p10 = pnand %p768_p5, %p762_p0 }
  0x29   : > { %772 = shalt.err (!%p769_p10)
}
  0x2a   : > { %s878_s6 = smov [#allocation8]   ;;  %s981_s7 = sadd.s32 1, %s873_s15  }
  0x2b   : > { %673 = dma.vmem_to_smem (!%p961_p11), %s147_s25, 16, %s878_s6, [#allocation5]  }
  0x2c   : > { %s28_s8 = sadd.s32 1, %s869_s14  ;;  %s25_s9 = ssub.s32 %s873_s15, %s981_s7 }
  0x2d   : > { %p35_p1 = scmp.ne.s32.totalorder %s869_s14, %s865_s13  ;;  %p26_p2 = scmp.eq.s32.totalorder %s25_s9, 0 }
  0x2e   : > { %p36_p6 = scmp.eq.s32.totalorder %s873_s15, 0  ;;  %p1248_p12 = scmp.eq.s32.totalorder %s930_s16, 1 }
  0x2f   : > { %p684_p7 = scmp.lt.s32.totalorder %s873_s15, 2  ;;  %s157_s17 = sand.u32 1, %s869_s14  }
  0x30   : > { %p991_p3 = por %p1248_p12, %p35_p1  ;;  %p37_p9 = por %p36_p6, %p35_p1 }
  0x31   : > { %s997_s11 = scalar_select %p26_p2, %s869_s14, %s28_s8  }
  0x32   : > { %s1249_s10 = scalar_select %p991_p3, 1, 0 }
  0x33   : > { %s652_s21 = smul.u32 48, %s157_s17  ;;  %p1001_p11 = pnand %p684_p7, %p37_p9 }
  0x34   : > { %s653_s22 = smul.u32 768, %s873_s15  ;;  %s158_s29 = scalar_lea.sflag [#allocation3], %s157_s17 }
  0x35   : > { %s161_s27 = scalar_lea.vmem [#allocation2], %s652_s21  ;;  %p775_p0 = pneg %p1001_p11 }
  0x36   : > { %s1008_s26 = scalar_lea.hbm %s1236_s0, %s653_s22  ;;  %s169_s28 = sshll.u32 %s161_s27, 4  ;;  %s170_s28 = int_to_ptr.vmem [resolvable:$true] %s169_s28 }
  0x37   : > { %s773_s30 = scalar_lea.hbm %s1008_s26, 768  ;;  %s778_s6 = scalar_lea.hbm %s1236_s0, 1536 }
  0x38   : > { %p774_p13 = scmp.ne.s32.totalorder %s1008_s26, %s773_s30  ;;  %p779_p1 = scmp.lt.s32.totalorder %s1008_s26, %s1236_s0 }
  0x39   : > { %p780_p2 = scmp.lt.s32.totalorder %s778_s6, %s773_s30 }
  0x3a   : > { %p776_p5 = pnand %p775_p0, %p774_p13 }
  0x3b   : > { %p781_p6 = por %p780_p2, %p779_p1 }
  0x3c   : > { %p777_p10 = pneg %p776_p5 }
  0x3e   : > { %p782_p12 = pnand %p781_p6, %p777_p10 }
  0x40   : > { %785 = shalt.err (!%p782_p12)
}
  0x41   : > { %s786_s21 = scalar_lea.vmem %s170_s28, 768  ;;  %s879_s17 = smov [#allocation2]  }
  0x42   : > { %p787_p7 = scmp.ne.s32.totalorder %s170_s28, %s786_s21  ;;  %s791_s22 = sshll.u32 %s879_s17, 4  ;;  %s792_s22 = int_to_ptr.vmem [resolvable:$false] %s791_s22 }
  0x43   : > { %s793_s24 = scalar_lea.vmem %s792_s22, 1536  ;;  %p794_p13 = scmp.lt.s32.totalorder %s170_s28, %s792_s22 }
  0x44   : > { %p789_p9 = pnand %p787_p7, %p775_p0  ;;  %p795_p5 = scmp.lt.s32.totalorder %s793_s24, %s786_s21 }
  0x46   : > { %p790_p3 = pneg %p789_p9  ;;  %p796_p4 = por %p795_p5, %p794_p13 }
  0x48   : > { %p797_p8 = pnand %p796_p4, %p790_p3 }
  0x4a   : > { %800 = shalt.err (!%p797_p8)
}
  0x4b   : > { %677 = dma.hbm_to_vmem [thread:$0]  (!%p1001_p11), %s1008_s26, 768, %s170_s28, %s158_s29  }
  0x4c   : > { %p1251_p10 = scmp.ne.s32.totalorder %s1246_s20, 0 }
  0x4d   : > { %s1027_s25 = sand.u32 (!%p1251_p10), 1, %s865_s13   ;;  %p1252_p0 = scmp.ne.s32.totalorder (!%p1251_p10), %s1244_s18, 0 }
  0x4e   : > { %178 = sbr.rel (%p1251_p10) target bundleno = 270 (0x10e), region = 32  ;;  %s181_s30 = scalar_lea.sflag (!%p1251_p10), [#allocation3], %s1027_s25 }
  0x4f   : > { %s654_s27 = smul.u32 (!%p1251_p10), 48, %s1027_s25 }
  0x51   : > { %s184_s4 = scalar_lea.vmem (!%p1251_p10), [#allocation2], %s654_s27 }
  0x53   : > { %844 = dma.done.wait (%p1252_p0), %s181_s30, 768  }
  0x54   : > { %846 = vsyncadd (%p1252_p0), %s181_s30, 4294966528  ;;  %p1253_p4 = scmp.eq.s32.totalorder %s930_s16, 0 }
  0x56   : > { %848 = dma.done.wait (%p1253_p4), [#allocation7], 2304   ;;  %p1254_p8 = pmov %p1253_p4 }
  0x57   : > { %p1255_p3 = pmov %p1253_p4 }
  0x58   : > { %850 = vsyncadd (%p1254_p8), [#allocation7], 4294964992 }
  0x59   : > { %852 = dma.done.wait (%p1255_p3), [#allocation5], 16   ;;  %p1256_p11 = pmov %p1255_p3 }
  0x5b   : > { %854 = vsyncadd (%p1256_p11), [#allocation5], 4294967280 }
  0x5c   : > { %197 = sfence }
  0x5d   : > { %s620_s20 = sld [smem:[#allocation8 + $0x1]]  ;;  %v1043_v0 = vld [vmem:[%s184_s4] sm:$0xff]  ;;  %v1045_v1 = vld [vmem:[%s184_s4 + $0x8] sm:$0xff]  ;;  %v1047_v2 = vld [vmem:[%s184_s4 + $0x10] sm:$0xff]  ;;  %s880_s27 = smov 16  }
  0x5e   : > { %s629_s23 = sld [smem:[#allocation8 + $0xa]]  ;;  %v1049_v3 = vld [vmem:[%s184_s4 + $0x18] sm:$0xff]  ;;  %v1051_v4 = vld [vmem:[%s184_s4 + $0x20] sm:$0xff]  ;;  %v1053_v5 = vld [vmem:[%s184_s4 + $0x28] sm:$0xff]  ;;  %p1257_p2 = scmp.ne.s32.totalorder %s1249_s10, 0 }
  0x5f   : > { %s638_s26 = sld [smem:[#allocation8 + $0x13]] }
  0x60   : > { %s216_s28 = sld [smem:[#allocation8]] }
  0x61   : > { %s628_s18 = sld [smem:[#allocation8 + $0x9]] }
  0x62   : > { %s637_s29 = sld [smem:[#allocation8 + $0x12]] }
  0x63   : > { %v280_v6 = vstv %s620_s20  ;;  %s1055_s5 = sld [smem:[#allocation8 + $0x2]] }
  0x64   : > { %v281_v7 = vmul.f32 %v280_v6, %v1043_v0  ;;  %v282_v8 = vmul.f32 %v280_v6, %v1045_v1  ;;  %v283_v9 = vstv %s629_s23  ;;  %s1059_s6 = sld [smem:[#allocation8 + $0xb]]  ;;  %s881_s23 = smov 17  }
  0x65   : > { %v284_v10 = vmul.f32 %v283_v9, %v1047_v2  ;;  %v285_v11 = vmul.f32 %v283_v9, %v1049_v3  ;;  %v288_v12 = vstv %s638_s26  ;;  %s1063_s8 = sld [smem:[#allocation8 + $0x14]] }
  0x66   : > { %v289_v13 = vmul.f32 %v288_v12, %v1051_v4  ;;  %v290_v14 = vmul.f32 %v288_v12, %v1053_v5  ;;  %v252_v15 = vstv %s216_s28  ;;  %s1067_s9 = sld [smem:[#allocation8 + $0x3]] }
  0x67   : > { %v286_v16 = vadd.f32 %v284_v10, %v281_v7  ;;  %v253_v17 = vmul.f32 %v252_v15, %v1043_v0  ;;  %v254_v18 = vmul.f32 %v252_v15, %v1045_v1  ;;  %v255_v19 = vstv %s628_s18  ;;  %s1071_s21 = sld [smem:[#allocation8 + $0xc]] }
  0x68   : > { %v256_v20 = vmul.f32 %v255_v19, %v1047_v2  ;;  %v257_v21 = vmul.f32 %v255_v19, %v1049_v3  ;;  %v260_v22 = vstv %s637_s29  ;;  %v287_v23 = vadd.f32 %v285_v11, %v282_v8  ;;  %s1075_s17 = sld [smem:[#allocation8 + $0x15]] }
  0x69   : > { %v291_v24 = vadd.f32 %v289_v13, %v286_v16  ;;  %v261_v25 = vmul.f32 %v260_v22, %v1051_v4  ;;  %v262_v26 = vmul.f32 %v260_v22, %v1053_v5  ;;  %v309_v27 = vstv %s1055_s5  ;;  %s1080_s22 = sld [smem:[#allocation8 + $0x5]] }
  0x6a   : > { %v258_v28 = vadd.f32 %v256_v20, %v253_v17  ;;  %v259_v29 = vadd.f32 %v257_v21, %v254_v18  ;;  %v311_v30 = vmul.f32 %v309_v27, %v1045_v1  ;;  %s1083_s24 = sld [smem:[#allocation8 + $0xe]]  ;;  %v292_v31 = vadd.f32 %v290_v14, %v287_v23 }
  0x6b   : > { %293 = vrot.lane.b32.xlu1 %v291_v24, %s880_s27  ;;  %v312_v32 = vstv %s1059_s6  ;;  %v317_v33 = vstv %s1063_s8  ;;  %v310_v34 = vmul.f32 %v309_v27, %v1043_v0  ;;  %s1088_s30 = sld [smem:[#allocation8 + $0x17]]  ;;  %s882_s6 = smov 15  }
  0x6c   : > { %v263_v35 = vadd.f32 %v261_v25, %v258_v28  ;;  %v264_v36 = vadd.f32 %v262_v26, %v259_v29  ;;  %v314_v37 = vmul.f32 %v312_v32, %v1049_v3  ;;  %v319_v38 = vmul.f32 %v317_v33, %v1053_v5  ;;  %s1092_s4 = sld [smem:[#allocation8 + $0x6]] }
  0x6d   : > { %v313_v39 = vmul.f32 %v312_v32, %v1047_v2  ;;  %v318_v40 = vmul.f32 %v317_v33, %v1051_v4  ;;  %v338_v41 = vstv %s1067_s9  ;;  %v341_v42 = vstv %s1071_s21  ;;  %s1098_s20 = sld [smem:[#allocation8 + $0xf]]  ;;  %s883_s21 = smov 1  }
  0x6e   : > { %265 = vrot.lane.b32.xlu0 %v263_v35, %s881_s23  ;;  %v316_v43 = vadd.f32 %v314_v37, %v311_v30  ;;  %v340_v44 = vmul.f32 %v338_v41, %v1045_v1  ;;  %v343_v45 = vmul.f32 %v341_v42, %v1049_v3  ;;  %v346_v46 = vstv %s1075_s17  ;;  %s1103_s26 = sld [smem:[#allocation8 + $0x18]] }
  0x6f   : > { %295 = vrot.lane.b32.xlu1 %v292_v31, %s880_s27  ;;  %v315_v47 = vadd.f32 %v313_v39, %v310_v34  ;;  %v348_v48 = vmul.f32 %v346_v46, %v1053_v5  ;;  %v339_v49 = vmul.f32 %v338_v41, %v1043_v0  ;;  %v342_v50 = vmul.f32 %v341_v42, %v1047_v2  ;;  %s1108_s28 = sld [smem:[#allocation8 + $0x7]]  ;;  %s884_s27 = smov 127  }
  0x70   : > { %v321_v51 = vadd.f32 %v319_v38, %v316_v43  ;;  %v345_v52 = vadd.f32 %v343_v45, %v340_v44  ;;  %v382_v53 = vstv %s1080_s22  ;;  %s1111_s18 = sld [smem:[#allocation8 + $0x10]]  ;;  %v347_v55 = vmul.f32 %v346_v46, %v1051_v4 }
  0x71   : > { %v344_v54 = vadd.f32 %v342_v50, %v339_v49  ;;  %v384_v56 = vmul.f32 %v382_v53, %v1045_v1  ;;  %v385_v57 = vstv %s1083_s24  ;;  %s1116_s29 = sld [smem:[#allocation8 + $0x19]]  ;;  %v320_v58 = vadd.f32 %v318_v40, %v315_v47 }
  0x72   : > { %267 = vrot.lane.b32.xlu0 %v264_v36, %s881_s23  ;;  %v387_v59 = vmul.f32 %v385_v57, %v1049_v3  ;;  %v390_v60 = vstv %s1088_s30  ;;  %v383_v61 = vmul.f32 %v382_v53, %v1043_v0  ;;  %s1121_s5 = sld [smem:[#allocation8 + $0x8]]  ;;  %v350_v62 = vadd.f32 %v348_v48, %v345_v52  ;;  %s885_s30 = smov 113  }
  0x73   : > { %324 = vrot.lane.b32.xlu1 %v321_v51, %s882_s6  ;;  %v392_v63 = vmul.f32 %v390_v60, %v1053_v5  ;;  %v386_v6 = vmul.f32 %v385_v57, %v1047_v2  ;;  %s1125_s8 = sld [smem:[#allocation8 + $0x11]]  ;;  %v411_v8 = vstv %s1092_s4  ;;  %v414_v9 = vstv %s1098_s20  ;;  %s886_s4 = smov 112  }
  0x74   : > { %v389_v7 = vadd.f32 %v387_v59, %v384_v56  ;;  %v419_v10 = vstv %s1103_s26  ;;  %s1130_s9 = sld [smem:[#allocation8 + $0x1a]]  ;;  %v349_v11 = vadd.f32 %v347_v55, %v344_v54  ;;  %v391_v12 = vmul.f32 %v390_v60, %v1051_v4  ;;  %s887_s20 = smov 111  }
  0x75   : > { %v413_v13 = vmul.f32 %v411_v8, %v1045_v1  ;;  %v416_v14 = vmul.f32 %v414_v9, %v1049_v3  ;;  %v388_v15 = vadd.f32 %v386_v6, %v383_v61  ;;  %v421_v16 = vmul.f32 %v419_v10, %v1053_v5  ;;  %s1140_s17 = sld [smem:[#allocation8 + $0x4]]  ;;  %v301_v6 = vld [vmem:[#allocation6 + $0x10] sm:$0xff]  ;;  %s619_s23 = sshll.u32 %s1027_s25, 4 }
  0x76   : > { %322 = vrot.lane.b32.xlu0 %v320_v58, %s882_s6  ;;  %v412_v17 = vmul.f32 %v411_v8, %v1043_v0  ;;  %v415_v18 = vmul.f32 %v414_v9, %v1047_v2  ;;  %v394_v19 = vadd.f32 %v392_v63, %v389_v7  ;;  %v440_v21 = vstv %s1108_s28  ;;  %s1145_s22 = sld [smem:[#allocation8 + $0xd]]  ;;  %v302_v7 = vld [vmem:[#allocation6 + $0x18] sm:$0xff]  ;;  %v274_v8 = vld [vmem:[#allocation6] sm:$0xff]  ;;  %v275_v9 = vld [vmem:[#allocation6 + $0x8] sm:$0xff]  ;;  %s651_s26 = sshll.u32 %s930_s16, 8 }
  0x77   : > { %353 = vrot.lane.b32.xlu1 %v350_v62, %s883_s21  ;;  %v418_v20 = vadd.f32 %v416_v14, %v413_v13  ;;  %v443_v22 = vstv %s1111_s18  ;;  %v442_v23 = vmul.f32 %v440_v21, %v1045_v1  ;;  %v448_v25 = vstv %s1116_s29  ;;  %s1150_s24 = sld [smem:[#allocation8 + $0x16]]  ;;  %v331_v13 = vld [vmem:[#allocation6 + $0x28] sm:$0xff]  ;;  %s215_s28 = scalar_lea.vmem [#allocation9], %s619_s23 }
  0x78   : > { %v445_v24 = vmul.f32 %v443_v22, %v1049_v3  ;;  %v420_v26 = vmul.f32 %v419_v10, %v1051_v4  ;;  %v441_v27 = vmul.f32 %v440_v21, %v1043_v0  ;;  %v444_v28 = vmul.f32 %v443_v22, %v1047_v2  ;;  %s518_s18 = sshll.u32 %s215_s28, 4  ;;  %s1199_s6 = scalar_lea.hbm %s1239_s3, %s651_s26  ;;  %s519_s18 = int_to_ptr.vmem [resolvable:$true] %s518_s18 }
  0x79   : > { %v393_v29 = vadd.f32 %v391_v12, %v388_v15  ;;  %v423_v30 = vadd.f32 %v421_v16, %v418_v20  ;;  %v417_v31 = vadd.f32 %v415_v18, %v412_v17  ;;  %v469_v32 = vstv %s1121_s5  ;;  %v330_v12 = vld [vmem:[#allocation6 + $0x20] sm:$0xff]  ;;  %v360_v20 = vld [vmem:[#allocation6 + $0x38] sm:$0xff]  ;;  %s504_s16 = scalar_lea.sflag [#allocation4], %s1027_s25 }
  0x7a   : > { %351 = vrot.lane.b32.xlu0 %v349_v11, %s883_s21  ;;  %v447_v33 = vadd.f32 %v445_v24, %v442_v23  ;;  %v450_v34 = vmul.f32 %v448_v25, %v1053_v5  ;;  %v471_v35 = vmul.f32 %v469_v32, %v1045_v1  ;;  %v472_v36 = vstv %s1125_s8  ;;  %s801_s8 = scalar_lea.vmem %s519_s18, 256 }
  0x7b   : > { %397 = vrot.lane.b32.xlu1 %v394_v19, %s884_s27  ;;  %v474_v37 = vmul.f32 %v472_v36, %v1049_v3  ;;  %v477_v38 = vstv %s1130_s9  ;;  %v446_v39 = vadd.f32 %v444_v28, %v441_v27  ;;  %v449_v40 = vmul.f32 %v448_v25, %v1051_v4  ;;  %v359_v19 = vld [vmem:[#allocation6 + $0x30] sm:$0xff]  ;;  %p802_p1 = scmp.ne.s32.totalorder %s519_s18, %s801_s8  ;;  %s888_s9 = smov [#allocation9]  }
  0x7c   : > { %v422_v41 = vadd.f32 %v420_v26, %v417_v31  ;;  %v470_v42 = vmul.f32 %v469_v32, %v1043_v0  ;;  %v473_v43 = vmul.f32 %v472_v36, %v1047_v2  ;;  %v452_v44 = vadd.f32 %v450_v34, %v447_v33  ;;  %s805_s21 = sshll.u32 %s888_s9, 4  ;;  %s806_s21 = int_to_ptr.vmem [resolvable:$false] %s805_s21 }
  0x7d   : > { %v476_v45 = vadd.f32 %v474_v37, %v471_v35  ;;  %v479_v46 = vmul.f32 %v477_v38, %v1053_v5  ;;  %v367_v47 = vstv %s1140_s17  ;;  %v370_v50 = vstv %s1145_s22  ;;  %p803_p6 = pnand %p802_p1, %p1257_p2  ;;  %s807_s17 = scalar_lea.vmem %s806_s21, 512 }
  0x7e   : > { %395 = vrot.lane.b32.xlu0 %v393_v29, %s884_s27  ;;  %v368_v48 = vmul.f32 %v367_v47, %v1043_v0  ;;  %v369_v49 = vmul.f32 %v367_v47, %v1045_v1  ;;  %v451_v51 = vadd.f32 %v449_v40, %v446_v39  ;;  %v371_v52 = vmul.f32 %v370_v50, %v1047_v2  ;;  %v403_v40 = vld [vmem:[#allocation6 + $0x50] sm:$0xff]  ;;  %v433_v47 = vld [vmem:[#allocation6 + $0x68] sm:$0xff]  ;;  %p808_p7 = scmp.lt.s32.totalorder %s519_s18, %s806_s21  ;;  %p809_p9 = scmp.lt.s32.totalorder %s807_s17, %s801_s8 }
  0x7f   : > { %426 = vrot.lane.b32.xlu1 %v423_v30, %s885_s30  ;;  %v372_v53 = vmul.f32 %v370_v50, %v1049_v3  ;;  %v375_v54 = vstv %s1150_s24  ;;  %v475_v55 = vadd.f32 %v473_v43, %v470_v42  ;;  %v478_v56 = vmul.f32 %v477_v38, %v1051_v4  ;;  %p804_p12 = pneg %p803_p6 }
  0x80   : > { %v376_v57 = vmul.f32 %v375_v54, %v1051_v4  ;;  %v377_v58 = vmul.f32 %v375_v54, %v1053_v5  ;;  %v481_v0 = vadd.f32 %v479_v46, %v476_v45  ;;  %v373_v59 = vadd.f32 %v371_v52, %v368_v48  ;;  %v432_v46 = vld [vmem:[#allocation6 + $0x60] sm:$0xff]  ;;  %v462_v52 = vld [vmem:[#allocation6 + $0x78] sm:$0xff]  ;;  %p810_p13 = por %p809_p9, %p808_p7 }
  0x81   : > { %v374_v1 = vadd.f32 %v372_v53, %v369_v49  ;;  %v480_v2 = vadd.f32 %v478_v56, %v475_v55  ;;  %v269_v3 = vlaneseq  ;;  %vm303_vm2 = vcmp.ne.f32.partialorder %v301_v6, 0.0 }
  0x82   : > { %424 = vrot.lane.b32.xlu0 %v422_v41, %s885_s30  ;;  %v1172_v60 = vadd.f32 %v376_v57, %v373_v59  ;;  %vm304_vm3 = vcmp.ne.f32.partialorder %v302_v7, 0.0  ;;  %vm276_vm4 = vcmp.ne.f32.partialorder %v274_v8, 0.0  ;;  %vm277_vm5 = vcmp.ne.f32.partialorder %v275_v9, 0.0  ;;  %v404_v41 = vld [vmem:[#allocation6 + $0x58] sm:$0xff]  ;;  %p811_p5 = pnand %p810_p13, %p804_p12 }
  0x83   : > { %455 = vrot.lane.b32.xlu1 %v452_v44, %s886_s4  ;;  %v1174_v61 = vadd.f32 %v377_v58, %v374_v1  ;;  %v1176_v4 = vand.u32 127, %v269_v3  ;;  %vm332_vm7 = vcmp.ne.f32.partialorder %v330_v12, 0.0  ;;  %vm333_vm8 = vcmp.ne.f32.partialorder %v331_v13, 0.0  ;;  %v490_v3 = vld [vmem:[#allocation6 + $0x80] sm:$0xff] }
  0x84   : > { %vm361_vm10 = vcmp.ne.f32.partialorder %v359_v19, 0.0  ;;  %vm362_vm11 = vcmp.ne.f32.partialorder %v360_v20, 0.0  ;;  %vm405_vm14 = vcmp.ne.f32.partialorder %v403_v40, 0.0  ;;  %vm406_vm15 = vcmp.ne.f32.partialorder %v404_v41, 0.0 }
  0x85   : > { %vm297_vm0 = vcmp.lt.s32.totalorder %v1176_v4, 16  ;;  %vm271_vm1 = vcmp.lt.s32.totalorder %v1176_v4, 17  ;;  %vm326_vm6 = vcmp.lt.s32.totalorder %v1176_v4, 15  ;;  %vm355_vm9 = vcmp.lt.s32.totalorder %v1176_v4, 1 }
  0x86   : > { %453 = vrot.lane.b32.xlu0 %v451_v51, %s886_s4  ;;  %vm399_vm12 = vcmp.lt.s32.totalorder %v1176_v4, 127  ;;  %vm428_vm13 = vcmp.lt.s32.totalorder %v1176_v4, 113  ;;  %v461_v51 = vld [vmem:[#allocation6 + $0x70] sm:$0xff] }
  0x87   : > { %484 = vrot.lane.b32.xlu1 %v481_v0, %s887_s20 }
  0x8a   : > { %482 = vrot.lane.b32.xlu0 %v480_v2, %s887_s20 }
  0xdd   : > { %v294_v62 = vpop.permute.xlu1 %293 }
  0xe0   : > { %v266_v63 = vpop.permute.xlu0 %265 }
  0xe1   : > { %v296_v5 = vpop.permute.xlu1 %295 }
  0xe2   : > { %v298_v14 = vsel %vm297_vm0, %v294_v62, %v296_v5  ;;  %v299_v15 = vsel %vm297_vm0, %v296_v5, %v294_v62  ;;  %vm434_vm0 = vcmp.ne.f32.partialorder %v432_v46, 0.0 }
  0xe3   : > { %v305_v24 = vsel %vm303_vm2, %v299_v15, 0.0  ;;  %v306_v25 = vsel %vm304_vm3, %v298_v14, 0.0  ;;  %vm457_vm2 = vcmp.lt.s32.totalorder %v1176_v4, 112  ;;  %vm463_vm3 = vcmp.ne.f32.partialorder %v461_v51, 0.0 }
  0xe4   : > { %v268_v10 = vpop.permute.xlu0 %267 }
  0xe5   : > { %v325_v11 = vpop.permute.xlu1 %324  ;;  %v272_v16 = vsel %vm271_vm1, %v266_v63, %v268_v10  ;;  %v273_v17 = vsel %vm271_vm1, %v268_v10, %v266_v63  ;;  %vm435_vm1 = vcmp.ne.f32.partialorder %v433_v47, 0.0 }
  0xe6   : > { %v278_v26 = vsel %vm276_vm4, %v273_v17, 0.0  ;;  %v279_v27 = vsel %vm277_vm5, %v272_v16, 0.0  ;;  %vm464_vm4 = vcmp.ne.f32.partialorder %v462_v52, 0.0  ;;  %vm486_vm5 = vcmp.lt.s32.totalorder %v1176_v4, 111 }
  0xe7   : > { %v307_v31 = vadd.f32 %v305_v24, %v278_v26  ;;  %v308_v32 = vadd.f32 %v306_v25, %v279_v27 }
  0xe8   : > { %v323_v18 = vpop.permute.xlu0 %322 }
  0xe9   : > { %v327_v21 = vsel %vm326_vm6, %v323_v18, %v325_v11  ;;  %v328_v22 = vsel %vm326_vm6, %v325_v11, %v323_v18  ;;  %v354_v23 = vpop.permute.xlu1 %353  ;;  %vm492_vm6 = vcmp.ne.f32.partialorder %v490_v3, 0.0 }
  0xea   : > { %v334_v28 = vsel %vm332_vm7, %v328_v22, 0.0  ;;  %v335_v29 = vsel %vm333_vm8, %v327_v21, 0.0 }
  0xeb   : > { %v336_v38 = vadd.f32 %v334_v28, %v307_v31  ;;  %v337_v39 = vadd.f32 %v335_v29, %v308_v32 }
  0xec   : > { %v352_v30 = vpop.permute.xlu0 %351 }
  0xed   : > { %v356_v33 = vsel %vm355_vm9, %v352_v30, %v354_v23  ;;  %v357_v34 = vsel %vm355_vm9, %v354_v23, %v352_v30  ;;  %v398_v35 = vpop.permute.xlu1 %397 }
  0xee   : > { %v363_v36 = vsel %vm361_vm10, %v357_v34, 0.0  ;;  %v364_v37 = vsel %vm362_vm11, %v356_v33, 0.0 }
  0xef   : > { %v365_v43 = vadd.f32 %v363_v36, %v336_v38  ;;  %v366_v44 = vadd.f32 %v364_v37, %v337_v39 }
  0xf0   : > { %v396_v42 = vpop.permute.xlu0 %395 }
  0xf1   : > { %v427_v45 = vpop.permute.xlu1 %426  ;;  %v400_v48 = vsel %vm399_vm12, %v396_v42, %v398_v35  ;;  %v401_v49 = vsel %vm399_vm12, %v398_v35, %v396_v42  ;;  %v380_v53 = vadd.f32 %v1172_v60, %v365_v43  ;;  %v381_v54 = vadd.f32 %v1174_v61, %v366_v44  ;;  %v491_v60 = vld [vmem:[#allocation6 + $0x88] sm:$0xff] }
  0xf2   : > { %v407_v58 = vsel %vm405_vm14, %v400_v48, 0.0  ;;  %v408_v0 = vsel %vm406_vm15, %v401_v49, 0.0  ;;  %vm493_vm7 = vcmp.ne.f32.partialorder %v491_v60, 0.0 }
  0xf3   : > { %v409_v62 = vadd.f32 %v407_v58, %v380_v53  ;;  %v410_v61 = vadd.f32 %v408_v0, %v381_v54 }
  0xf4   : > { %v425_v50 = vpop.permute.xlu0 %424 }
  0xf5   : > { %v429_v55 = vsel %vm428_vm13, %v425_v50, %v427_v45  ;;  %v430_v56 = vsel %vm428_vm13, %v427_v45, %v425_v50  ;;  %v456_v57 = vpop.permute.xlu1 %455 }
  0xf6   : > { %v436_v59 = vsel %vm434_vm0, %v429_v55, 0.0  ;;  %v437_v1 = vsel %vm435_vm1, %v430_v56, 0.0 }
  0xf7   : > { %v438_v9 = vadd.f32 %v436_v59, %v409_v62  ;;  %v439_v10 = vadd.f32 %v437_v1, %v410_v61 }
  0xf8   : > { %v454_v2 = vpop.permute.xlu0 %453 }
  0xf9   : > { %v458_v63 = vsel %vm457_vm2, %v454_v2, %v456_v57  ;;  %v459_v5 = vsel %vm457_vm2, %v456_v57, %v454_v2  ;;  %v485_v8 = vpop.permute.xlu1 %484 }
  0xfa   : > { %v465_v6 = vsel %vm463_vm3, %v458_v63, 0.0  ;;  %v466_v7 = vsel %vm464_vm4, %v459_v5, 0.0 }
  0xfb   : > { %v467_v12 = vadd.f32 %v465_v6, %v438_v9  ;;  %v468_v13 = vadd.f32 %v466_v7, %v439_v10 }
  0xfc   : > { %v483_v11 = vpop.permute.xlu0 %482 }
  0xfd   : > { %v487_v14 = vsel %vm486_vm5, %v483_v11, %v485_v8  ;;  %v488_v15 = vsel %vm486_vm5, %v485_v8, %v483_v11 }
  0xfe   : > { %v494_v16 = vsel %vm492_vm6, %v487_v14, 0.0  ;;  %v495_v17 = vsel %vm493_vm7, %v488_v15, 0.0 }
  0xff   : > { %v496_v18 = vadd.f32 %v494_v16, %v467_v12  ;;  %v497_v19 = vadd.f32 %v495_v17, %v468_v13 }
 0x101   : > { %501 = vst [vmem:[%s215_s28] sm:$0xff] %v496_v18  ;;  %502 = vst [vmem:[%s215_s28 + $0x8] sm:$0xff] %v497_v19 }
 0x102   : > { %814 = shalt.err (!%p811_p5)
}
 0x103   : > { %s815_s22 = scalar_lea.hbm %s1199_s6, 256  ;;  %s819_s27 = scalar_lea.hbm %s1239_s3, 512 }
 0x104   : > { %p816_p10 = scmp.ne.s32.totalorder %s1199_s6, %s815_s22  ;;  %p820_p8 = scmp.lt.s32.totalorder %s1199_s6, %s1239_s3 }
 0x105   : > { %p821_p3 = scmp.lt.s32.totalorder %s819_s27, %s815_s22 }
 0x106   : > { %p817_p0 = pnand %p816_p10, %p1257_p2 }
 0x107   : > { %p822_p11 = por %p821_p3, %p820_p8 }
 0x108   : > { %p818_p4 = pneg %p817_p0 }
 0x10a   : > { %p823_p1 = pnand %p822_p11, %p818_p4 }
 0x10c   : > { %826 = shalt.err (!%p823_p1)
}
 0x10d   : > { %665 = dma.vmem_to_hbm [thread:$0]  (%p1257_p2), %s519_s18, 256, %s1199_s6, %s504_s16  }
 0x10e PF: > { %s530_s20 = sand.u32 1, %s861_s12   ;;  %p1258_p6 = scmp.ne.s32.totalorder %s1245_s19, 0 }
 0x10f   : > { %p1259_p12 = scmp.ge.s32.totalorder %s873_s15, 2  ;;  %s531_s23 = scalar_lea.sflag [#allocation4], %s530_s20 }
 0x111   : > { %p679_p7 = pnand %p1259_p12, %p1258_p6 }
 0x113   : > { %p680_p9 = pneg %p679_p7 }
 0x115   : > { %856 = dma.done.wait (%p680_p9), %s531_s23, 256  }
 0x116   : > { %858 = vsyncadd (%p680_p9), %s531_s23, 4294967040  ;;  %p18_p13 = scmp.ge.s32.totalorder %s981_s7, 4   ;;  %s1260_s12 = smov %s865_s13 }
 0x117   : > { %s1261_s13 = smov %s869_s14  ;;  %s1262_s14 = smov %s997_s11 }
 0x118   : > { %s1263_s15 = smov %s981_s7  ;;  %20 = sbr.rel (!%p18_p13) target bundleno = 7 (0x7), region = 95 }
 0x11d   :  { %536 = vsyncpa [#allocation3], 1 }
 0x11e   :  { %538 = vsyncpa [#allocation3 + $0x1], 1 }
 0x11f   :  { %539 = vsyncpa [#allocation7], 1 }
 0x120   :  { %540 = vsyncpa [#allocation4], 1 }
 0x121   :  { %542 = vsyncpa [#allocation4 + $0x1], 1 }
 0x122   :  { %543 = vsyncpa [#allocation5], 1 }
 0x123   :  { %545 = vsyncpa [#allocation5 + $0x1], 1 }

</bundles_post_ra>
